<compile_context>
chip_gen: v7x
topology: tpu7x:2x2x1
jax: 0.10.0
libtpu: 0.0.40
codegen_flags: <defaults>
</compile_context>

<pallas_src>
import jax
import jax.numpy as jnp
from jax.experimental import pallas as pl
from jax.experimental.pallas import tpu as pltpu


def _round_up(x: int, m: int) -> int:
    return ((x + m - 1) // m) * m


def _defuzz_kernel(x_ref, w_ref, b_ref, o_ref):
    # x_ref: (TB, C) VMEM  batch tile (tail rows of a ragged last block are garbage,
    #                      but their outputs are dropped by Pallas' bounds masking)
    # w_ref: (F, C)  VMEM  resident weight (PyTorch Linear layout)
    # b_ref: (F,)    SMEM  bias scalars
    # o_ref: (TB, F) VMEM  output tile
    F = w_ref.shape[0]                      # static, tiny (default 1)
    x = x_ref[...]                          # (TB, C) f32
    w = w_ref[...]                          # (F, C)  f32
    cols = []
    for f in range(F):                      # static Python loop over output features
        # VPU multiply + XLU lane reduce: exact f32, no MXU, no transpose.
        col = jnp.sum(x * w[f:f + 1, :], axis=-1, keepdims=True)   # (TB, 1)
        cols.append(col + b_ref[f])
    out = cols[0] if F == 1 else jnp.concatenate(cols, axis=-1)    # (TB, F)
    o_ref[...] = out.astype(o_ref.dtype)


def defuzzification(x_interp: jax.Array, weight: jax.Array, bias: jax.Array,
                    *, batch_tile: int = 8192,
                    min_pallas_batch: int = 1024) -> jax.Array:
    """Defuzzification Linear layer.

    x_interp: (B, C) float32
    weight:   (F, C) float32  (PyTorch nn.Linear convention)
    bias:     (F,)   float32
    returns:  (B, F) float32
    """
    B, C = x_interp.shape
    F = weight.shape[0]
    assert weight.shape == (F, C)
    assert bias.shape == (F,)

    # Small-batch fallback: kernel launch + one grid step costs more than the op.
    if B < min_pallas_batch:
        y = jnp.dot(x_interp, weight.T,
                    precision=jax.lax.Precision.HIGHEST,
                    preferred_element_type=jnp.float32) + bias
        return y.astype(x_interp.dtype)

    # Batch tile: >= 1 MiB of x per step, rows multiple of 8 (sublane), and at
    # least two grid steps so "parallel" can shard across v7x's 2 TensorCores.
    TB = min(batch_tile, _round_up(pl.cdiv(B, 2), 8))
    grid = (pl.cdiv(B, TB),)           # ragged last block handled by Pallas

    cost = pl.CostEstimate(
        flops=2 * B * C * F,
        bytes_accessed=4 * (B * C + F * C + F + B * F),
        transcendentals=0,
    )

    return pl.pallas_call(
        _defuzz_kernel,
        out_shape=jax.ShapeDtypeStruct((B, F), x_interp.dtype),
        grid=grid,
        in_specs=[
            pl.BlockSpec((TB, C), lambda i: (i, 0)),              # streamed x tiles
            pl.BlockSpec((F, C), lambda i: (0, 0)),               # weight: resident
            pl.BlockSpec(memory_space=pltpu.MemorySpace.SMEM),    # bias scalars
        ],
        out_specs=pl.BlockSpec((TB, F), lambda i: (i, 0)),
        compiler_params=pltpu.CompilerParams(
            dimension_semantics=("parallel",),
            # NOTE: if xprof shows exposed DMA on v7x, add
            # pipeline_mode=pl.Buffered(3) on the x BlockSpec (~+1 MiB VMEM).
        ),
        cost_estimate=cost,
    )(x_interp, weight, bias)


if __name__ == "__main__":
    # Module config: n_output_classes=32, n_features_output=1 (defaults)
    n_output_classes = 32
    n_features_output = 1

    key = jax.random.PRNGKey(0)
    kx, kw, kb, kx2, kx3 = jax.random.split(key, 5)

    # Deterministic init mimicking torch.nn.Linear: U(-1/sqrt(in), 1/sqrt(in))
    bound = 1.0 / jnp.sqrt(jnp.float32(n_output_classes))
    weight = jax.random.uniform(
        kw, (n_features_output, n_output_classes), jnp.float32, -bound, bound)
    bias = jax.random.uniform(
        kb, (n_features_output,), jnp.float32, -bound, bound)

    def reference(x):
        return jnp.dot(x, weight.T, precision=jax.lax.Precision.HIGHEST) + bias

    # --- small demo batch (fallback path, matches the module's toy usage) ---
    x_small = jax.random.uniform(kx, (8, n_output_classes), jnp.float32)
    out_small = defuzzification(x_small, weight, bias)
    jax.block_until_ready(out_small)
    assert out_small.shape == (8, n_features_output)
    assert jnp.allclose(out_small, reference(x_small), atol=1e-5, rtol=1e-5)

    # --- aligned batch through the Pallas kernel (TB=1024, grid=(2,)) ---
    x_mid = jax.random.uniform(kx2, (2048, n_output_classes), jnp.float32)
    out_mid = defuzzification(x_mid, weight, bias)
    jax.block_until_ready(out_mid)
    assert out_mid.shape == (2048, n_features_output)
    assert jnp.allclose(out_mid, reference(x_mid), atol=1e-5, rtol=1e-5)

    # --- non-aligned batch: ragged last block, no padding pass ---
    x_big = jax.random.uniform(kx3, (2050, n_output_classes), jnp.float32)
    out_big = defuzzification(x_big, weight, bias)
    jax.block_until_ready(out_big)
    assert out_big.shape == (2050, n_features_output)
    assert jnp.allclose(out_big, reference(x_big), atol=1e-5, rtol=1e-5)

    print("KERNEL_OK")
</pallas_src>

<mosaic_0001>
module attributes {stable_mosaic.version = 11 : i64} {
  func.func @_defuzz_kernel(%arg0: i32, %arg1: memref<1024x32xf32, #tpu.memory_space<vmem>>, %arg2: memref<1x32xf32, #tpu.memory_space<vmem>>, %arg3: memref<1xf32, #tpu.memory_space<smem>>, %arg4: memref<1024x1xf32, #tpu.memory_space<vmem>>) attributes {dimension_semantics = [#tpu.dimension_semantics<parallel>], iteration_bounds = array<i64: 2>, scalar_prefetch = 0 : i64, scratch_operands = 0 : i64, tpu.core_type = #tpu.core_type<tc>, window_params = [{transform_indices = @transform_0, window_bounds = array<i64: 1024, 32>}, {pipeline_mode = #tpu.pipeline_mode<synchronous>, transform_indices = @transform_1, window_bounds = array<i64: 1, 32>}, {transform_indices = @transform_2, window_bounds = array<i64: 1>}, {transform_indices = @transform_3, window_bounds = array<i64: 1024, 1>}]} {
    %c0 = arith.constant 0 : index
    %c0_0 = arith.constant 0 : index
    %0 = vector.load %arg1[%c0, %c0_0] : memref<1024x32xf32, #tpu.memory_space<vmem>>, vector<1024x32xf32>
    %c0_1 = arith.constant 0 : index
    %c0_2 = arith.constant 0 : index
    %1 = vector.load %arg2[%c0_1, %c0_2] : memref<1x32xf32, #tpu.memory_space<vmem>>, vector<1x32xf32>
    %2 = vector.broadcast %1 : vector<1x32xf32> to vector<1024x32xf32>
    %3 = arith.mulf %0, %2 : vector<1024x32xf32>
    %cst = arith.constant dense<0.000000e+00> : vector<1024xf32>
    %4 = vector.multi_reduction <add>, %3, %cst [1] : vector<1024x32xf32> to vector<1024xf32>
    %5 = vector.shape_cast %4 : vector<1024xf32> to vector<1024x1xf32>
    %c0_3 = arith.constant 0 : index
    %6 = memref.load %arg3[%c0_3] : memref<1xf32, #tpu.memory_space<smem>>
    %7 = vector.broadcast %6 : f32 to vector<1024x1xf32>
    %8 = arith.addf %5, %7 : vector<1024x1xf32>
    %c0_4 = arith.constant 0 : index
    %c0_5 = arith.constant 0 : index
    %9 = vector.load %arg4[%c0_4, %c0_5] : memref<1024x1xf32, #tpu.memory_space<vmem>>, vector<1024x1xf32>
    tpu.vector_store %arg4[%c0_4, %c0_5], %8 {strides = array<i32>} : memref<1024x1xf32, #tpu.memory_space<vmem>>, vector<1024x1xf32>,
    return
  }
  func.func @transform_0(%arg0: i32) -> (i32, i32) {
    %c0_i32 = arith.constant 0 : i32
    %c0_i32_0 = arith.constant 0 : i32
    return %arg0, %c0_i32 : i32, i32
  }
  func.func @transform_1(%arg0: i32) -> (i32, i32) {
    %c0_i32 = arith.constant 0 : i32
    %c0_i32_0 = arith.constant 0 : i32
    %c0_i32_1 = arith.constant 0 : i32
    return %c0_i32, %c0_i32_0 : i32, i32
  }
  func.func @transform_2(%arg0: i32) -> i32 {
    %c0_i32 = arith.constant 0 : i32
    %c0_i32_0 = arith.constant 0 : i32
    return %c0_i32 : i32
  }
  func.func @transform_3(%arg0: i32) -> (i32, i32) {
    %c0_i32 = arith.constant 0 : i32
    %c0_i32_0 = arith.constant 0 : i32
    return %arg0, %c0_i32 : i32, i32
  }
}

</mosaic_0001>

<bundles_post_ra>
// kernel: tpu_custom_call.1
= control target key start
LH: loop header
LB: loop body
LE: loop exit
PB: predicated region body
PF: predicated region fallthrough
CT: control target
= control target key end

     0   :  { %s1190_s14 = smov 0   ;;  %s1998_s0 = inlined_call_operand.vmem [shape: f32[2048,32], index: 0, kind: input, shape index: {}]   ;;  %s1999_s1 = inlined_call_operand.vmem [shape: f32[1,32], index: 1, kind: input, shape index: {}]   ;;  %s2000_s2 = inlined_call_operand.<no memory space> [shape: f32[1], index: 2, kind: input, shape index: {}]   ;;  %s2001_s3 = inlined_call_operand.vmem [shape: f32[2048,1], index: 3, kind: output, shape index: {}]  }
   0x1   :  { %8 = sst [smem:[#allocation2]] %s2000_s2 }
   0x2 LB: > { %s1138_s15 = sadd.s32 4294967295, %s1165_s14   ;;  %p1142_p0 = scmp.ge.s32.totalorder %s1165_s14, 1  ;;  %s1165_s14 = sphi %s1190_s14, %s14_s14  }
   0x3   : > { %p139_p1 = scmp.lt.s32.totalorder %s1165_s14, 3 }
   0x5   : > { %p140_p2 = pnand %p1142_p0, %p139_p1 }
   0x6   : > { %s1143_s16 = sshll.u32 (!%p140_p2), %s1138_s15, 7  ;;  %v1204_v0 = vld [vmem:[%s1999_s1] ss:$0 sm:$0xff] (!%p140_p2)  ;;  %vm438_vm0 = vcmask (!%p140_p2), 261120   ;;  %s823_s22 = sld [smem:[#allocation2]] (!%p140_p2)  ;;  %vm953_vm1 = vcmask (!%p140_p2), 7168  }
   0x7   : > { %143 = sbr.rel (%p140_p2) target bundleno = 418 (0x1a2), region = 32  ;;  %p164_p3 = scmp.lt.s32.totalorder (!%p140_p2), %s1143_s16, 255 }
   0xe   : > { %s2003_s16 = smov (!%p164_p3, %s1143_s16), 255 }
   0xf   : > { %s1144_s2 = sshll.u32 %s2003_s16, 3 }
  0x10   : > { %s1211_s21 = scalar_lea.vmem %s1998_s0, %s1144_s2  ;;  %s1442_s25 = scalar_lea.vmem %s2001_s3, %s1144_s2 }
  0x11   : > { %v177_v1 = vld [vmem:[%s1211_s21 + $0x10] sm:$0xff]  ;;  %v175_v2 = vld [vmem:[%s1211_s21] sm:$0xff]  ;;  %v178_v3 = vld [vmem:[%s1211_s21 + $0x18] sm:$0xff] }
  0x12   : > { %v312_v4 = vmul.f32 %v1204_v0, %v177_v1  ;;  %v310_v5 = vmul.f32 %v1204_v0, %v175_v2  ;;  %v313_v6 = vmul.f32 %v1204_v0, %v178_v3  ;;  %v176_v7 = vld [vmem:[%s1211_s21 + $0x8] sm:$0xff]  ;;  %v179_v10 = vld [vmem:[%s1211_s21 + $0x20] sm:$0xff]  ;;  %v182_v17 = vld [vmem:[%s1211_s21 + $0x38] sm:$0xff] }
  0x13   : > { %v311_v8 = vmul.f32 %v1204_v0, %v176_v7  ;;  %v180_v9 = vld [vmem:[%s1211_s21 + $0x28] sm:$0xff]  ;;  %v314_v16 = vmul.f32 %v1204_v0, %v179_v10  ;;  %v181_v18 = vld [vmem:[%s1211_s21 + $0x30] sm:$0xff]  ;;  %v317_v21 = vmul.f32 %v1204_v0, %v182_v17  ;;  %v183_v24 = vld [vmem:[%s1211_s21 + $0x40] sm:$0xff] }
  0x14   : > { %v445_v11 = vsel %vm438_vm0, %v312_v4, 0.0  ;;  %v439_v12 = vsel %vm438_vm0, %v310_v5, 0.0  ;;  %v448_v13 = vsel %vm438_vm0, %v313_v6, 0.0  ;;  %v315_v15 = vmul.f32 %v1204_v0, %v180_v9  ;;  %v184_v23 = vld [vmem:[%s1211_s21 + $0x48] sm:$0xff]  ;;  %v186_v29 = vld [vmem:[%s1211_s21 + $0x58] sm:$0xff]  ;;  %v185_v30 = vld [vmem:[%s1211_s21 + $0x50] sm:$0xff] }
  0x15   : > { %446 = vadd.xlane.f32.xlu1 %v445_v11  ;;  %440 = vadd.xlane.f32.xlu0 %v439_v12  ;;  %v442_v14 = vsel %vm438_vm0, %v311_v8, 0.0  ;;  %v451_v20 = vsel %vm438_vm0, %v314_v16, 0.0  ;;  %v316_v22 = vmul.f32 %v1204_v0, %v181_v18  ;;  %v460_v25 = vsel %vm438_vm0, %v317_v21, 0.0  ;;  %v188_v35 = vld [vmem:[%s1211_s21 + $0x68] sm:$0xff]  ;;  %v187_v36 = vld [vmem:[%s1211_s21 + $0x60] sm:$0xff]  ;;  %v190_v41 = vld [vmem:[%s1211_s21 + $0x78] sm:$0xff] }
  0x16   : > { %v454_v19 = vsel %vm438_vm0, %v315_v15, 0.0  ;;  %v319_v27 = vmul.f32 %v1204_v0, %v184_v23  ;;  %v318_v28 = vmul.f32 %v1204_v0, %v183_v24  ;;  %v321_v33 = vmul.f32 %v1204_v0, %v186_v29  ;;  %v189_v42 = vld [vmem:[%s1211_s21 + $0x70] sm:$0xff]  ;;  %v192_v47 = vld [vmem:[%s1211_s21 + $0x88] sm:$0xff]  ;;  %v191_v48 = vld [vmem:[%s1211_s21 + $0x80] sm:$0xff] }
  0x17   : > { %v457_v26 = vsel %vm438_vm0, %v316_v22, 0.0  ;;  %v320_v34 = vmul.f32 %v1204_v0, %v185_v30  ;;  %v323_v39 = vmul.f32 %v1204_v0, %v188_v35  ;;  %v322_v40 = vmul.f32 %v1204_v0, %v187_v36  ;;  %v194_v53 = vld [vmem:[%s1211_s21 + $0x98] sm:$0xff]  ;;  %v193_v54 = vld [vmem:[%s1211_s21 + $0x90] sm:$0xff]  ;;  %v196_v59 = vld [vmem:[%s1211_s21 + $0xa8] sm:$0xff] }
  0x18   : > { %v466_v31 = vsel %vm438_vm0, %v319_v27, 0.0  ;;  %v463_v32 = vsel %vm438_vm0, %v318_v28, 0.0  ;;  %v472_v37 = vsel %vm438_vm0, %v321_v33, 0.0  ;;  %v325_v45 = vmul.f32 %v1204_v0, %v190_v41  ;;  %v195_v60 = vld [vmem:[%s1211_s21 + $0xa0] sm:$0xff]  ;;  %v198_v2 = vld [vmem:[%s1211_s21 + $0xb8] sm:$0xff]  ;;  %v197_v3 = vld [vmem:[%s1211_s21 + $0xb0] sm:$0xff] }
  0x19   : > { %449 = vadd.xlane.f32.xlu1 %v448_v13  ;;  %443 = vadd.xlane.f32.xlu0 %v442_v14  ;;  %v469_v38 = vsel %vm438_vm0, %v320_v34, 0.0  ;;  %v478_v43 = vsel %vm438_vm0, %v323_v39, 0.0  ;;  %v475_v44 = vsel %vm438_vm0, %v322_v40, 0.0  ;;  %v324_v46 = vmul.f32 %v1204_v0, %v189_v42  ;;  %v200_v8 = vld [vmem:[%s1211_s21 + $0xc8] sm:$0xff]  ;;  %v199_v9 = vld [vmem:[%s1211_s21 + $0xc0] sm:$0xff]  ;;  %v202_v14 = vld [vmem:[%s1211_s21 + $0xd8] sm:$0xff] }
  0x1a   : > { %v484_v49 = vsel %vm438_vm0, %v325_v45, 0.0  ;;  %v327_v51 = vmul.f32 %v1204_v0, %v192_v47  ;;  %v326_v52 = vmul.f32 %v1204_v0, %v191_v48  ;;  %v329_v57 = vmul.f32 %v1204_v0, %v194_v53  ;;  %v201_v15 = vld [vmem:[%s1211_s21 + $0xd0] sm:$0xff]  ;;  %v203_v21 = vld [vmem:[%s1211_s21 + $0xe0] sm:$0xff] }
  0x1b   : > { %v481_v50 = vsel %vm438_vm0, %v324_v46, 0.0  ;;  %v328_v58 = vmul.f32 %v1204_v0, %v193_v54  ;;  %v331_v63 = vmul.f32 %v1204_v0, %v196_v59  ;;  %v330_v1 = vmul.f32 %v1204_v0, %v195_v60  ;;  %v205_v27 = vld [vmem:[%s1211_s21 + $0xf0] sm:$0xff]  ;;  %v207_v33 = vld [vmem:[%s1211_s21 + $0x100] sm:$0xff] }
  0x1c   : > { %v490_v55 = vsel %vm438_vm0, %v327_v51, 0.0  ;;  %v487_v56 = vsel %vm438_vm0, %v326_v52, 0.0  ;;  %v496_v61 = vsel %vm438_vm0, %v329_v57, 0.0  ;;  %v333_v6 = vmul.f32 %v1204_v0, %v198_v2  ;;  %v209_v39 = vld [vmem:[%s1211_s21 + $0x110] sm:$0xff]  ;;  %v211_v45 = vld [vmem:[%s1211_s21 + $0x120] sm:$0xff] }
  0x1d   : > { %455 = vadd.xlane.f32.xlu1 %v454_v19  ;;  %452 = vadd.xlane.f32.xlu0 %v451_v20  ;;  %v493_v62 = vsel %vm438_vm0, %v328_v58, 0.0  ;;  %v502_v4 = vsel %vm438_vm0, %v331_v63, 0.0  ;;  %v499_v5 = vsel %vm438_vm0, %v330_v1, 0.0  ;;  %v332_v7 = vmul.f32 %v1204_v0, %v197_v3  ;;  %v204_v20 = vld [vmem:[%s1211_s21 + $0xe8] sm:$0xff]  ;;  %v213_v51 = vld [vmem:[%s1211_s21 + $0x130] sm:$0xff]  ;;  %v215_v57 = vld [vmem:[%s1211_s21 + $0x140] sm:$0xff] }
  0x1e   : > { %v508_v10 = vsel %vm438_vm0, %v333_v6, 0.0  ;;  %v335_v12 = vmul.f32 %v1204_v0, %v200_v8  ;;  %v334_v13 = vmul.f32 %v1204_v0, %v199_v9  ;;  %v337_v18 = vmul.f32 %v1204_v0, %v202_v14  ;;  %v217_v63 = vld [vmem:[%s1211_s21 + $0x150] sm:$0xff]  ;;  %v219_v6 = vld [vmem:[%s1211_s21 + $0x160] sm:$0xff] }
  0x1f   : > { %v505_v11 = vsel %vm438_vm0, %v332_v7, 0.0  ;;  %v336_v19 = vmul.f32 %v1204_v0, %v201_v15  ;;  %v339_v24 = vmul.f32 %v1204_v0, %v204_v20 }
  0x20   : > { %v514_v16 = vsel %vm438_vm0, %v335_v12, 0.0  ;;  %v511_v17 = vsel %vm438_vm0, %v334_v13, 0.0  ;;  %v520_v22 = vsel %vm438_vm0, %v337_v18, 0.0  ;;  %v221_v12 = vld [vmem:[%s1211_s21 + $0x170] sm:$0xff]  ;;  %v223_v18 = vld [vmem:[%s1211_s21 + $0x180] sm:$0xff] }
  0x21   : > { %461 = vadd.xlane.f32.xlu1 %v460_v25  ;;  %458 = vadd.xlane.f32.xlu0 %v457_v26  ;;  %v517_v23 = vsel %vm438_vm0, %v336_v19, 0.0  ;;  %v338_v25 = vmul.f32 %v1204_v0, %v203_v21  ;;  %v206_v26 = vld [vmem:[%s1211_s21 + $0xf8] sm:$0xff]  ;;  %v526_v28 = vsel %vm438_vm0, %v339_v24, 0.0  ;;  %v225_v24 = vld [vmem:[%s1211_s21 + $0x190] sm:$0xff] }
  0x22   : > { %v341_v30 = vmul.f32 %v1204_v0, %v206_v26 }
  0x23   : > { %v523_v29 = vsel %vm438_vm0, %v338_v25, 0.0 }
  0x24   : > { %v532_v34 = vsel %vm438_vm0, %v341_v30, 0.0  ;;  %v227_v30 = vld [vmem:[%s1211_s21 + $0x1a0] sm:$0xff] }
  0x25   : > { %467 = vadd.xlane.f32.xlu1 %v466_v31  ;;  %464 = vadd.xlane.f32.xlu0 %v463_v32  ;;  %v340_v31 = vmul.f32 %v1204_v0, %v205_v27  ;;  %v208_v32 = vld [vmem:[%s1211_s21 + $0x108] sm:$0xff] }
  0x26   : > { %v343_v36 = vmul.f32 %v1204_v0, %v208_v32 }
  0x27   : > { %v529_v35 = vsel %vm438_vm0, %v340_v31, 0.0 }
  0x28   : > { %v538_v40 = vsel %vm438_vm0, %v343_v36, 0.0  ;;  %v229_v36 = vld [vmem:[%s1211_s21 + $0x1b0] sm:$0xff] }
  0x29   : > { %473 = vadd.xlane.f32.xlu1 %v472_v37  ;;  %470 = vadd.xlane.f32.xlu0 %v469_v38  ;;  %v342_v37 = vmul.f32 %v1204_v0, %v207_v33  ;;  %v210_v38 = vld [vmem:[%s1211_s21 + $0x118] sm:$0xff] }
  0x2a   : > { %v345_v42 = vmul.f32 %v1204_v0, %v210_v38 }
  0x2b   : > { %v535_v41 = vsel %vm438_vm0, %v342_v37, 0.0 }
  0x2c   : > { %v544_v46 = vsel %vm438_vm0, %v345_v42, 0.0  ;;  %v231_v42 = vld [vmem:[%s1211_s21 + $0x1c0] sm:$0xff] }
  0x2d   : > { %479 = vadd.xlane.f32.xlu1 %v478_v43  ;;  %476 = vadd.xlane.f32.xlu0 %v475_v44  ;;  %v344_v43 = vmul.f32 %v1204_v0, %v209_v39  ;;  %v212_v44 = vld [vmem:[%s1211_s21 + $0x128] sm:$0xff] }
  0x2e   : > { %v347_v48 = vmul.f32 %v1204_v0, %v212_v44 }
  0x2f   : > { %v541_v47 = vsel %vm438_vm0, %v344_v43, 0.0 }
  0x30   : > { %v550_v52 = vsel %vm438_vm0, %v347_v48, 0.0  ;;  %v233_v48 = vld [vmem:[%s1211_s21 + $0x1d0] sm:$0xff] }
  0x31   : > { %485 = vadd.xlane.f32.xlu1 %v484_v49  ;;  %482 = vadd.xlane.f32.xlu0 %v481_v50  ;;  %v346_v49 = vmul.f32 %v1204_v0, %v211_v45  ;;  %v214_v50 = vld [vmem:[%s1211_s21 + $0x138] sm:$0xff] }
  0x32   : > { %v349_v54 = vmul.f32 %v1204_v0, %v214_v50 }
  0x33   : > { %v547_v53 = vsel %vm438_vm0, %v346_v49, 0.0 }
  0x34   : > { %v556_v58 = vsel %vm438_vm0, %v349_v54, 0.0  ;;  %v235_v54 = vld [vmem:[%s1211_s21 + $0x1e0] sm:$0xff] }
  0x35   : > { %491 = vadd.xlane.f32.xlu1 %v490_v55  ;;  %488 = vadd.xlane.f32.xlu0 %v487_v56  ;;  %v348_v55 = vmul.f32 %v1204_v0, %v213_v51  ;;  %v216_v56 = vld [vmem:[%s1211_s21 + $0x148] sm:$0xff] }
  0x36   : > { %v351_v60 = vmul.f32 %v1204_v0, %v216_v56 }
  0x37   : > { %v553_v59 = vsel %vm438_vm0, %v348_v55, 0.0 }
  0x38   : > { %v562_v1 = vsel %vm438_vm0, %v351_v60, 0.0  ;;  %v237_v60 = vld [vmem:[%s1211_s21 + $0x1f0] sm:$0xff] }
  0x39   : > { %497 = vadd.xlane.f32.xlu1 %v496_v61  ;;  %494 = vadd.xlane.f32.xlu0 %v493_v62  ;;  %v350_v61 = vmul.f32 %v1204_v0, %v215_v57  ;;  %v218_v62 = vld [vmem:[%s1211_s21 + $0x158] sm:$0xff] }
  0x3a   : > { %v353_v3 = vmul.f32 %v1204_v0, %v218_v62 }
  0x3b   : > { %v559_v2 = vsel %vm438_vm0, %v350_v61, 0.0 }
  0x3c   : > { %v568_v7 = vsel %vm438_vm0, %v353_v3, 0.0  ;;  %v239_v3 = vld [vmem:[%s1211_s21 + $0x200] sm:$0xff] }
  0x3d   : > { %503 = vadd.xlane.f32.xlu1 %v502_v4  ;;  %500 = vadd.xlane.f32.xlu0 %v499_v5  ;;  %v352_v4 = vmul.f32 %v1204_v0, %v217_v63  ;;  %v220_v5 = vld [vmem:[%s1211_s21 + $0x168] sm:$0xff] }
  0x3e   : > { %v355_v9 = vmul.f32 %v1204_v0, %v220_v5 }
  0x3f   : > { %v565_v8 = vsel %vm438_vm0, %v352_v4, 0.0 }
  0x40   : > { %v574_v13 = vsel %vm438_vm0, %v355_v9, 0.0  ;;  %v241_v9 = vld [vmem:[%s1211_s21 + $0x210] sm:$0xff] }
  0x41   : > { %509 = vadd.xlane.f32.xlu1 %v508_v10  ;;  %506 = vadd.xlane.f32.xlu0 %v505_v11  ;;  %v354_v10 = vmul.f32 %v1204_v0, %v219_v6  ;;  %v222_v11 = vld [vmem:[%s1211_s21 + $0x178] sm:$0xff] }
  0x42   : > { %v357_v15 = vmul.f32 %v1204_v0, %v222_v11 }
  0x43   : > { %v571_v14 = vsel %vm438_vm0, %v354_v10, 0.0 }
  0x44   : > { %v580_v19 = vsel %vm438_vm0, %v357_v15, 0.0  ;;  %v243_v15 = vld [vmem:[%s1211_s21 + $0x220] sm:$0xff] }
  0x45   : > { %515 = vadd.xlane.f32.xlu1 %v514_v16  ;;  %512 = vadd.xlane.f32.xlu0 %v511_v17  ;;  %v356_v16 = vmul.f32 %v1204_v0, %v221_v12  ;;  %v224_v17 = vld [vmem:[%s1211_s21 + $0x188] sm:$0xff] }
  0x46   : > { %v359_v21 = vmul.f32 %v1204_v0, %v224_v17 }
  0x47   : > { %v577_v20 = vsel %vm438_vm0, %v356_v16, 0.0 }
  0x48   : > { %v586_v25 = vsel %vm438_vm0, %v359_v21, 0.0  ;;  %v245_v21 = vld [vmem:[%s1211_s21 + $0x230] sm:$0xff] }
  0x49   : > { %521 = vadd.xlane.f32.xlu1 %v520_v22  ;;  %518 = vadd.xlane.f32.xlu0 %v517_v23  ;;  %v358_v22 = vmul.f32 %v1204_v0, %v223_v18  ;;  %v226_v23 = vld [vmem:[%s1211_s21 + $0x198] sm:$0xff] }
  0x4a   : > { %v361_v27 = vmul.f32 %v1204_v0, %v226_v23 }
  0x4b   : > { %v583_v26 = vsel %vm438_vm0, %v358_v22, 0.0 }
  0x4c   : > { %v592_v31 = vsel %vm438_vm0, %v361_v27, 0.0  ;;  %v247_v27 = vld [vmem:[%s1211_s21 + $0x240] sm:$0xff] }
  0x4d   : > { %527 = vadd.xlane.f32.xlu1 %v526_v28  ;;  %524 = vadd.xlane.f32.xlu0 %v523_v29  ;;  %v360_v28 = vmul.f32 %v1204_v0, %v225_v24  ;;  %v228_v29 = vld [vmem:[%s1211_s21 + $0x1a8] sm:$0xff] }
  0x4e   : > { %v363_v33 = vmul.f32 %v1204_v0, %v228_v29 }
  0x4f   : > { %v589_v32 = vsel %vm438_vm0, %v360_v28, 0.0 }
  0x50   : > { %v598_v37 = vsel %vm438_vm0, %v363_v33, 0.0  ;;  %v249_v33 = vld [vmem:[%s1211_s21 + $0x250] sm:$0xff] }
  0x51   : > { %533 = vadd.xlane.f32.xlu1 %v532_v34  ;;  %530 = vadd.xlane.f32.xlu0 %v529_v35  ;;  %v362_v34 = vmul.f32 %v1204_v0, %v227_v30  ;;  %v230_v35 = vld [vmem:[%s1211_s21 + $0x1b8] sm:$0xff] }
  0x52   : > { %v365_v39 = vmul.f32 %v1204_v0, %v230_v35 }
  0x53   : > { %v595_v38 = vsel %vm438_vm0, %v362_v34, 0.0  ;;  %v1435_v34 = vstv %s823_s22 }
  0x54   : > { %v604_v43 = vsel %vm438_vm0, %v365_v39, 0.0 }
  0x55   : > { %539 = vadd.xlane.f32.xlu1 %v538_v40  ;;  %536 = vadd.xlane.f32.xlu0 %v535_v41  ;;  %v364_v40 = vmul.f32 %v1204_v0, %v229_v36  ;;  %v232_v41 = vld [vmem:[%s1211_s21 + $0x1c8] sm:$0xff] }
  0x56   : > { %v367_v45 = vmul.f32 %v1204_v0, %v232_v41 }
  0x57   : > { %v601_v44 = vsel %vm438_vm0, %v364_v40, 0.0  ;;  %v384_v40 = vmul.f32 %v1204_v0, %v249_v33 }
  0x58   : > { %v610_v49 = vsel %vm438_vm0, %v367_v45, 0.0 }
  0x59   : > { %545 = vadd.xlane.f32.xlu1 %v544_v46  ;;  %542 = vadd.xlane.f32.xlu0 %v541_v47  ;;  %v366_v46 = vmul.f32 %v1204_v0, %v231_v42  ;;  %v234_v47 = vld [vmem:[%s1211_s21 + $0x1d8] sm:$0xff] }
  0x5a   : > { %v369_v51 = vmul.f32 %v1204_v0, %v234_v47 }
  0x5b   : > { %v607_v50 = vsel %vm438_vm0, %v366_v46, 0.0 }
  0x5c   : > { %v616_v55 = vsel %vm438_vm0, %v369_v51, 0.0 }
  0x5d   : > { %551 = vadd.xlane.f32.xlu1 %v550_v52  ;;  %548 = vadd.xlane.f32.xlu0 %v547_v53  ;;  %v368_v52 = vmul.f32 %v1204_v0, %v233_v48  ;;  %v236_v53 = vld [vmem:[%s1211_s21 + $0x1e8] sm:$0xff]  ;;  %v661_v48 = vsel %vm438_vm0, %v384_v40, 0.0 }
  0x5e   : > { %v371_v57 = vmul.f32 %v1204_v0, %v236_v53  ;;  %v254_v53 = vld [vmem:[%s1211_s21 + $0x278] sm:$0xff] }
  0x5f   : > { %v613_v56 = vsel %vm438_vm0, %v368_v52, 0.0 }
  0x60   : > { %v622_v61 = vsel %vm438_vm0, %v371_v57, 0.0 }
  0x61   : > { %557 = vadd.xlane.f32.xlu1 %v556_v58  ;;  %554 = vadd.xlane.f32.xlu0 %v553_v59  ;;  %v370_v58 = vmul.f32 %v1204_v0, %v235_v54  ;;  %v238_v59 = vld [vmem:[%s1211_s21 + $0x1f8] sm:$0xff]  ;;  %v253_v54 = vld [vmem:[%s1211_s21 + $0x270] sm:$0xff] }
  0x62   : > { %v373_v63 = vmul.f32 %v1204_v0, %v238_v59  ;;  %v389_v59 = vmul.f32 %v1204_v0, %v254_v53 }
  0x63   : > { %v619_v62 = vsel %vm438_vm0, %v370_v58, 0.0 }
  0x64   : > { %v628_v4 = vsel %vm438_vm0, %v373_v63, 0.0  ;;  %v256_v63 = vld [vmem:[%s1211_s21 + $0x288] sm:$0xff] }
  0x65   : > { %563 = vadd.xlane.f32.xlu1 %v562_v1  ;;  %560 = vadd.xlane.f32.xlu0 %v559_v2  ;;  %v372_v1 = vmul.f32 %v1204_v0, %v237_v60  ;;  %v240_v2 = vld [vmem:[%s1211_s21 + $0x208] sm:$0xff]  ;;  %v388_v60 = vmul.f32 %v1204_v0, %v253_v54 }
  0x66   : > { %v375_v6 = vmul.f32 %v1204_v0, %v240_v2 }
  0x67   : > { %v625_v5 = vsel %vm438_vm0, %v372_v1, 0.0  ;;  %v255_v1 = vld [vmem:[%s1211_s21 + $0x280] sm:$0xff] }
  0x68   : > { %v634_v10 = vsel %vm438_vm0, %v375_v6, 0.0  ;;  %v391_v6 = vmul.f32 %v1204_v0, %v256_v63 }
  0x69   : > { %569 = vadd.xlane.f32.xlu1 %v568_v7  ;;  %566 = vadd.xlane.f32.xlu0 %v565_v8  ;;  %v374_v7 = vmul.f32 %v1204_v0, %v239_v3  ;;  %v242_v8 = vld [vmem:[%s1211_s21 + $0x218] sm:$0xff] }
  0x6a   : > { %v377_v12 = vmul.f32 %v1204_v0, %v242_v8 }
  0x6b   : > { %v631_v11 = vsel %vm438_vm0, %v374_v7, 0.0  ;;  %v390_v7 = vmul.f32 %v1204_v0, %v255_v1 }
  0x6c   : > { %v640_v16 = vsel %vm438_vm0, %v377_v12, 0.0 }
  0x6d   : > { %575 = vadd.xlane.f32.xlu1 %v574_v13  ;;  %572 = vadd.xlane.f32.xlu0 %v571_v14  ;;  %v376_v13 = vmul.f32 %v1204_v0, %v241_v9  ;;  %v244_v14 = vld [vmem:[%s1211_s21 + $0x228] sm:$0xff] }
  0x6e   : > { %v379_v18 = vmul.f32 %v1204_v0, %v244_v14  ;;  %v682_v14 = vsel %vm438_vm0, %v391_v6, 0.0 }
  0x6f   : > { %v637_v17 = vsel %vm438_vm0, %v376_v13, 0.0 }
  0x70   : > { %v646_v22 = vsel %vm438_vm0, %v379_v18, 0.0 }
  0x71   : > { %581 = vadd.xlane.f32.xlu1 %v580_v19  ;;  %578 = vadd.xlane.f32.xlu0 %v577_v20  ;;  %v378_v19 = vmul.f32 %v1204_v0, %v243_v15  ;;  %v246_v20 = vld [vmem:[%s1211_s21 + $0x238] sm:$0xff]  ;;  %v679_v15 = vsel %vm438_vm0, %v390_v7, 0.0 }
  0x72   : > { %v381_v24 = vmul.f32 %v1204_v0, %v246_v20  ;;  %v260_v20 = vld [vmem:[%s1211_s21 + $0x2a8] sm:$0xff] }
  0x73   : > { %v643_v23 = vsel %vm438_vm0, %v378_v19, 0.0 }
  0x74   : > { %v652_v28 = vsel %vm438_vm0, %v381_v24, 0.0 }
  0x75   : > { %587 = vadd.xlane.f32.xlu1 %v586_v25  ;;  %584 = vadd.xlane.f32.xlu0 %v583_v26  ;;  %v380_v25 = vmul.f32 %v1204_v0, %v245_v21  ;;  %v248_v26 = vld [vmem:[%s1211_s21 + $0x248] sm:$0xff]  ;;  %v259_v21 = vld [vmem:[%s1211_s21 + $0x2a0] sm:$0xff] }
  0x76   : > { %v383_v30 = vmul.f32 %v1204_v0, %v248_v26  ;;  %v395_v26 = vmul.f32 %v1204_v0, %v260_v20 }
  0x77   : > { %v649_v29 = vsel %vm438_vm0, %v380_v25, 0.0 }
  0x79   : > { %593 = vadd.xlane.f32.xlu1 %v592_v31  ;;  %590 = vadd.xlane.f32.xlu0 %v589_v32  ;;  %v382_v31 = vmul.f32 %v1204_v0, %v247_v27  ;;  %v250_v32 = vld [vmem:[%s1211_s21 + $0x258] sm:$0xff]  ;;  %v394_v27 = vmul.f32 %v1204_v0, %v259_v21 }
  0x7a   : > { %v385_v39 = vmul.f32 %v1204_v0, %v250_v32 }
  0x7c   : > { %v664_v47 = vsel %vm438_vm0, %v385_v39, 0.0 }
  0x7d   : > { %599 = vadd.xlane.f32.xlu1 %v598_v37  ;;  %596 = vadd.xlane.f32.xlu0 %v595_v38  ;;  %v658_v37 = vsel %vm438_vm0, %v383_v30, 0.0  ;;  %v655_v38 = vsel %vm438_vm0, %v382_v31, 0.0  ;;  %v262_v30 = vld [vmem:[%s1211_s21 + $0x2b8] sm:$0xff]  ;;  %v261_v31 = vld [vmem:[%s1211_s21 + $0x2b0] sm:$0xff] }
  0x81   : > { %605 = vadd.xlane.f32.xlu1 %v604_v43  ;;  %602 = vadd.xlane.f32.xlu0 %v601_v44  ;;  %v252_v43 = vld [vmem:[%s1211_s21 + $0x268] sm:$0xff]  ;;  %v251_v44 = vld [vmem:[%s1211_s21 + $0x260] sm:$0xff] }
  0x85   : > { %611 = vadd.xlane.f32.xlu1 %v610_v49  ;;  %608 = vadd.xlane.f32.xlu0 %v607_v50  ;;  %v387_v49 = vmul.f32 %v1204_v0, %v252_v43  ;;  %v386_v50 = vmul.f32 %v1204_v0, %v251_v44 }
  0x87   : > { %v670_v57 = vsel %vm438_vm0, %v387_v49, 0.0  ;;  %v667_v58 = vsel %vm438_vm0, %v386_v50, 0.0 }
  0x89   : > { %617 = vadd.xlane.f32.xlu1 %v616_v55  ;;  %614 = vadd.xlane.f32.xlu0 %v613_v56 }
  0x8d   : > { %623 = vadd.xlane.f32.xlu1 %v622_v61  ;;  %620 = vadd.xlane.f32.xlu0 %v619_v62 }
  0x91   : > { %629 = vadd.xlane.f32.xlu1 %v628_v4  ;;  %626 = vadd.xlane.f32.xlu0 %v625_v5  ;;  %v676_v4 = vsel %vm438_vm0, %v389_v59, 0.0  ;;  %v673_v5 = vsel %vm438_vm0, %v388_v60, 0.0 }
  0x95   : > { %635 = vadd.xlane.f32.xlu1 %v634_v10  ;;  %632 = vadd.xlane.f32.xlu0 %v631_v11  ;;  %v258_v10 = vld [vmem:[%s1211_s21 + $0x298] sm:$0xff]  ;;  %v257_v11 = vld [vmem:[%s1211_s21 + $0x290] sm:$0xff] }
  0x99   : > { %641 = vadd.xlane.f32.xlu1 %v640_v16  ;;  %638 = vadd.xlane.f32.xlu0 %v637_v17  ;;  %v393_v16 = vmul.f32 %v1204_v0, %v258_v10  ;;  %v392_v17 = vmul.f32 %v1204_v0, %v257_v11 }
  0x9b   : > { %v688_v24 = vsel %vm438_vm0, %v393_v16, 0.0  ;;  %v685_v25 = vsel %vm438_vm0, %v392_v17, 0.0 }
  0x9d   : > { %647 = vadd.xlane.f32.xlu1 %v646_v22  ;;  %644 = vadd.xlane.f32.xlu0 %v643_v23 }
  0xa1   : > { %653 = vadd.xlane.f32.xlu1 %v652_v28  ;;  %650 = vadd.xlane.f32.xlu0 %v649_v29 }
  0xa2   : > { %v447_v35 = vpop.xlane.xlu1 %446  ;;  %v441_v36 = vpop.xlane.xlu0 %440 }
  0xa3   : > { %v827_v41 = vadd.f32 %v1435_v34, %v447_v35  ;;  %v825_v42 = vadd.f32 %v1435_v34, %v441_v36  ;;  %v694_v35 = vsel %vm438_vm0, %v395_v26, 0.0  ;;  %v691_v36 = vsel %vm438_vm0, %v394_v27, 0.0 }
  0xa5   : > { %956 = vst.msk [vmem:[%s1442_s25 + $0x10] sm:$0xff] %vm953_vm1, %v827_v41  ;;  %954 = vst.msk [vmem:[%s1442_s25] sm:$0xff] %vm953_vm1, %v825_v42  ;;  %659 = vadd.xlane.f32.xlu1 %v658_v37  ;;  %656 = vadd.xlane.f32.xlu0 %v655_v38  ;;  %v397_v37 = vmul.f32 %v1204_v0, %v262_v30  ;;  %v396_v38 = vmul.f32 %v1204_v0, %v261_v31  ;;  %v264_v41 = vld [vmem:[%s1211_s21 + $0x2c8] sm:$0xff]  ;;  %v263_v42 = vld [vmem:[%s1211_s21 + $0x2c0] sm:$0xff] }
  0xa6   : > { %v450_v45 = vpop.xlane.xlu1 %449  ;;  %v444_v46 = vpop.xlane.xlu0 %443 }
  0xa7   : > { %v828_v51 = vadd.f32 %v1435_v34, %v450_v45  ;;  %v826_v52 = vadd.f32 %v1435_v34, %v444_v46  ;;  %v700_v45 = vsel %vm438_vm0, %v397_v37, 0.0  ;;  %v697_v46 = vsel %vm438_vm0, %v396_v38, 0.0 }
  0xa9   : > { %957 = vst.msk [vmem:[%s1442_s25 + $0x18] sm:$0xff] %vm953_vm1, %v828_v51  ;;  %955 = vst.msk [vmem:[%s1442_s25 + $0x8] sm:$0xff] %vm953_vm1, %v826_v52  ;;  %665 = vadd.xlane.f32.xlu1 %v664_v47  ;;  %662 = vadd.xlane.f32.xlu0 %v661_v48  ;;  %v399_v47 = vmul.f32 %v1204_v0, %v264_v41  ;;  %v398_v48 = vmul.f32 %v1204_v0, %v263_v42  ;;  %v266_v51 = vld [vmem:[%s1211_s21 + $0x2d8] sm:$0xff]  ;;  %v265_v52 = vld [vmem:[%s1211_s21 + $0x2d0] sm:$0xff] }
  0xaa   : > { %v456_v55 = vpop.xlane.xlu1 %455  ;;  %v453_v56 = vpop.xlane.xlu0 %452 }
  0xab   : > { %v830_v61 = vadd.f32 %v1435_v34, %v456_v55  ;;  %v829_v62 = vadd.f32 %v1435_v34, %v453_v56  ;;  %v706_v55 = vsel %vm438_vm0, %v399_v47, 0.0  ;;  %v703_v56 = vsel %vm438_vm0, %v398_v48, 0.0 }
  0xad   : > { %959 = vst.msk [vmem:[%s1442_s25 + $0x28] sm:$0xff] %vm953_vm1, %v830_v61  ;;  %958 = vst.msk [vmem:[%s1442_s25 + $0x20] sm:$0xff] %vm953_vm1, %v829_v62  ;;  %671 = vadd.xlane.f32.xlu1 %v670_v57  ;;  %668 = vadd.xlane.f32.xlu0 %v667_v58  ;;  %v401_v57 = vmul.f32 %v1204_v0, %v266_v51  ;;  %v400_v58 = vmul.f32 %v1204_v0, %v265_v52  ;;  %v268_v61 = vld [vmem:[%s1211_s21 + $0x2e8] sm:$0xff]  ;;  %v267_v62 = vld [vmem:[%s1211_s21 + $0x2e0] sm:$0xff] }
  0xae   : > { %v462_v2 = vpop.xlane.xlu1 %461  ;;  %v459_v3 = vpop.xlane.xlu0 %458 }
  0xaf   : > { %v832_v8 = vadd.f32 %v1435_v34, %v462_v2  ;;  %v831_v9 = vadd.f32 %v1435_v34, %v459_v3  ;;  %v712_v2 = vsel %vm438_vm0, %v401_v57, 0.0  ;;  %v709_v3 = vsel %vm438_vm0, %v400_v58, 0.0 }
  0xb1   : > { %961 = vst.msk [vmem:[%s1442_s25 + $0x38] sm:$0xff] %vm953_vm1, %v832_v8  ;;  %960 = vst.msk [vmem:[%s1442_s25 + $0x30] sm:$0xff] %vm953_vm1, %v831_v9  ;;  %677 = vadd.xlane.f32.xlu1 %v676_v4  ;;  %674 = vadd.xlane.f32.xlu0 %v673_v5  ;;  %v403_v4 = vmul.f32 %v1204_v0, %v268_v61  ;;  %v402_v5 = vmul.f32 %v1204_v0, %v267_v62  ;;  %v270_v8 = vld [vmem:[%s1211_s21 + $0x2f8] sm:$0xff]  ;;  %v269_v9 = vld [vmem:[%s1211_s21 + $0x2f0] sm:$0xff] }
  0xb2   : > { %v468_v12 = vpop.xlane.xlu1 %467  ;;  %v465_v13 = vpop.xlane.xlu0 %464 }
  0xb3   : > { %v834_v18 = vadd.f32 %v1435_v34, %v468_v12  ;;  %v833_v19 = vadd.f32 %v1435_v34, %v465_v13  ;;  %v718_v12 = vsel %vm438_vm0, %v403_v4, 0.0  ;;  %v715_v13 = vsel %vm438_vm0, %v402_v5, 0.0 }
  0xb5   : > { %963 = vst.msk [vmem:[%s1442_s25 + $0x48] sm:$0xff] %vm953_vm1, %v834_v18  ;;  %962 = vst.msk [vmem:[%s1442_s25 + $0x40] sm:$0xff] %vm953_vm1, %v833_v19  ;;  %683 = vadd.xlane.f32.xlu1 %v682_v14  ;;  %680 = vadd.xlane.f32.xlu0 %v679_v15  ;;  %v405_v14 = vmul.f32 %v1204_v0, %v270_v8  ;;  %v404_v15 = vmul.f32 %v1204_v0, %v269_v9  ;;  %v272_v18 = vld [vmem:[%s1211_s21 + $0x308] sm:$0xff]  ;;  %v271_v19 = vld [vmem:[%s1211_s21 + $0x300] sm:$0xff] }
  0xb6   : > { %v474_v22 = vpop.xlane.xlu1 %473  ;;  %v471_v23 = vpop.xlane.xlu0 %470 }
  0xb7   : > { %v836_v28 = vadd.f32 %v1435_v34, %v474_v22  ;;  %v835_v29 = vadd.f32 %v1435_v34, %v471_v23  ;;  %v724_v22 = vsel %vm438_vm0, %v405_v14, 0.0  ;;  %v721_v23 = vsel %vm438_vm0, %v404_v15, 0.0 }
  0xb9   : > { %965 = vst.msk [vmem:[%s1442_s25 + $0x58] sm:$0xff] %vm953_vm1, %v836_v28  ;;  %964 = vst.msk [vmem:[%s1442_s25 + $0x50] sm:$0xff] %vm953_vm1, %v835_v29  ;;  %689 = vadd.xlane.f32.xlu1 %v688_v24  ;;  %686 = vadd.xlane.f32.xlu0 %v685_v25  ;;  %v407_v24 = vmul.f32 %v1204_v0, %v272_v18  ;;  %v406_v25 = vmul.f32 %v1204_v0, %v271_v19  ;;  %v274_v28 = vld [vmem:[%s1211_s21 + $0x318] sm:$0xff]  ;;  %v273_v29 = vld [vmem:[%s1211_s21 + $0x310] sm:$0xff] }
  0xba   : > { %v480_v32 = vpop.xlane.xlu1 %479  ;;  %v477_v33 = vpop.xlane.xlu0 %476 }
  0xbb   : > { %v838_v39 = vadd.f32 %v1435_v34, %v480_v32  ;;  %v837_v40 = vadd.f32 %v1435_v34, %v477_v33  ;;  %v730_v32 = vsel %vm438_vm0, %v407_v24, 0.0  ;;  %v727_v33 = vsel %vm438_vm0, %v406_v25, 0.0 }
  0xbd   : > { %967 = vst.msk [vmem:[%s1442_s25 + $0x68] sm:$0xff] %vm953_vm1, %v838_v39  ;;  %966 = vst.msk [vmem:[%s1442_s25 + $0x60] sm:$0xff] %vm953_vm1, %v837_v40  ;;  %695 = vadd.xlane.f32.xlu1 %v694_v35  ;;  %692 = vadd.xlane.f32.xlu0 %v691_v36  ;;  %v409_v35 = vmul.f32 %v1204_v0, %v274_v28  ;;  %v408_v36 = vmul.f32 %v1204_v0, %v273_v29  ;;  %v276_v39 = vld [vmem:[%s1211_s21 + $0x328] sm:$0xff]  ;;  %v275_v40 = vld [vmem:[%s1211_s21 + $0x320] sm:$0xff] }
  0xbe   : > { %v486_v43 = vpop.xlane.xlu1 %485  ;;  %v483_v44 = vpop.xlane.xlu0 %482 }
  0xbf   : > { %v840_v49 = vadd.f32 %v1435_v34, %v486_v43  ;;  %v839_v50 = vadd.f32 %v1435_v34, %v483_v44  ;;  %v736_v43 = vsel %vm438_vm0, %v409_v35, 0.0  ;;  %v733_v44 = vsel %vm438_vm0, %v408_v36, 0.0 }
  0xc1   : > { %969 = vst.msk [vmem:[%s1442_s25 + $0x78] sm:$0xff] %vm953_vm1, %v840_v49  ;;  %968 = vst.msk [vmem:[%s1442_s25 + $0x70] sm:$0xff] %vm953_vm1, %v839_v50  ;;  %701 = vadd.xlane.f32.xlu1 %v700_v45  ;;  %698 = vadd.xlane.f32.xlu0 %v697_v46  ;;  %v411_v45 = vmul.f32 %v1204_v0, %v276_v39  ;;  %v410_v46 = vmul.f32 %v1204_v0, %v275_v40  ;;  %v278_v49 = vld [vmem:[%s1211_s21 + $0x338] sm:$0xff]  ;;  %v277_v50 = vld [vmem:[%s1211_s21 + $0x330] sm:$0xff] }
  0xc2   : > { %v492_v53 = vpop.xlane.xlu1 %491  ;;  %v489_v54 = vpop.xlane.xlu0 %488 }
  0xc3   : > { %v842_v59 = vadd.f32 %v1435_v34, %v492_v53  ;;  %v841_v60 = vadd.f32 %v1435_v34, %v489_v54  ;;  %v742_v53 = vsel %vm438_vm0, %v411_v45, 0.0  ;;  %v739_v54 = vsel %vm438_vm0, %v410_v46, 0.0 }
  0xc5   : > { %971 = vst.msk [vmem:[%s1442_s25 + $0x88] sm:$0xff] %vm953_vm1, %v842_v59  ;;  %970 = vst.msk [vmem:[%s1442_s25 + $0x80] sm:$0xff] %vm953_vm1, %v841_v60  ;;  %707 = vadd.xlane.f32.xlu1 %v706_v55  ;;  %704 = vadd.xlane.f32.xlu0 %v703_v56  ;;  %v413_v55 = vmul.f32 %v1204_v0, %v278_v49  ;;  %v412_v56 = vmul.f32 %v1204_v0, %v277_v50  ;;  %v280_v59 = vld [vmem:[%s1211_s21 + $0x348] sm:$0xff]  ;;  %v279_v60 = vld [vmem:[%s1211_s21 + $0x340] sm:$0xff] }
  0xc6   : > { %v498_v63 = vpop.xlane.xlu1 %497  ;;  %v495_v1 = vpop.xlane.xlu0 %494 }
  0xc7   : > { %v844_v6 = vadd.f32 %v1435_v34, %v498_v63  ;;  %v843_v7 = vadd.f32 %v1435_v34, %v495_v1  ;;  %v748_v0 = vsel %vm438_vm0, %v413_v55, 0.0  ;;  %v745_v63 = vsel %vm438_vm0, %v412_v56, 0.0  ;;  %v1629_v1 = vld [vmem:[%s1999_s1] ss:$0 sm:$0xff] }
  0xc9   : > { %973 = vst.msk [vmem:[%s1442_s25 + $0x98] sm:$0xff] %vm953_vm1, %v844_v6  ;;  %972 = vst.msk [vmem:[%s1442_s25 + $0x90] sm:$0xff] %vm953_vm1, %v843_v7  ;;  %713 = vadd.xlane.f32.xlu1 %v712_v2  ;;  %710 = vadd.xlane.f32.xlu0 %v709_v3  ;;  %v415_v2 = vmul.f32 %v1629_v1, %v280_v59  ;;  %v414_v3 = vmul.f32 %v1629_v1, %v279_v60  ;;  %v282_v6 = vld [vmem:[%s1211_s21 + $0x358] sm:$0xff]  ;;  %v281_v7 = vld [vmem:[%s1211_s21 + $0x350] sm:$0xff] }
  0xca   : > { %v504_v10 = vpop.xlane.xlu1 %503  ;;  %v501_v11 = vpop.xlane.xlu0 %500 }
  0xcb   : > { %v846_v16 = vadd.f32 %v1435_v34, %v504_v10  ;;  %v845_v17 = vadd.f32 %v1435_v34, %v501_v11  ;;  %v754_v10 = vsel %vm438_vm0, %v415_v2, 0.0  ;;  %v751_v11 = vsel %vm438_vm0, %v414_v3, 0.0 }
  0xcd   : > { %975 = vst.msk [vmem:[%s1442_s25 + $0xa8] sm:$0xff] %vm953_vm1, %v846_v16  ;;  %974 = vst.msk [vmem:[%s1442_s25 + $0xa0] sm:$0xff] %vm953_vm1, %v845_v17  ;;  %719 = vadd.xlane.f32.xlu1 %v718_v12  ;;  %716 = vadd.xlane.f32.xlu0 %v715_v13  ;;  %v417_v12 = vmul.f32 %v1629_v1, %v282_v6  ;;  %v416_v13 = vmul.f32 %v1629_v1, %v281_v7  ;;  %v284_v16 = vld [vmem:[%s1211_s21 + $0x368] sm:$0xff]  ;;  %v283_v17 = vld [vmem:[%s1211_s21 + $0x360] sm:$0xff] }
  0xce   : > { %v510_v20 = vpop.xlane.xlu1 %509  ;;  %v507_v21 = vpop.xlane.xlu0 %506 }
  0xcf   : > { %v848_v26 = vadd.f32 %v1435_v34, %v510_v20  ;;  %v847_v27 = vadd.f32 %v1435_v34, %v507_v21  ;;  %v760_v20 = vsel %vm438_vm0, %v417_v12, 0.0  ;;  %v757_v21 = vsel %vm438_vm0, %v416_v13, 0.0 }
  0xd1   : > { %977 = vst.msk [vmem:[%s1442_s25 + $0xb8] sm:$0xff] %vm953_vm1, %v848_v26  ;;  %976 = vst.msk [vmem:[%s1442_s25 + $0xb0] sm:$0xff] %vm953_vm1, %v847_v27  ;;  %725 = vadd.xlane.f32.xlu1 %v724_v22  ;;  %722 = vadd.xlane.f32.xlu0 %v721_v23  ;;  %v419_v22 = vmul.f32 %v1629_v1, %v284_v16  ;;  %v418_v23 = vmul.f32 %v1629_v1, %v283_v17  ;;  %v286_v26 = vld [vmem:[%s1211_s21 + $0x378] sm:$0xff]  ;;  %v285_v27 = vld [vmem:[%s1211_s21 + $0x370] sm:$0xff] }
  0xd2   : > { %v516_v30 = vpop.xlane.xlu1 %515  ;;  %v513_v31 = vpop.xlane.xlu0 %512 }
  0xd3   : > { %v850_v37 = vadd.f32 %v1435_v34, %v516_v30  ;;  %v849_v38 = vadd.f32 %v1435_v34, %v513_v31  ;;  %v766_v30 = vsel %vm438_vm0, %v419_v22, 0.0  ;;  %v763_v31 = vsel %vm438_vm0, %v418_v23, 0.0 }
  0xd5   : > { %979 = vst.msk [vmem:[%s1442_s25 + $0xc8] sm:$0xff] %vm953_vm1, %v850_v37  ;;  %978 = vst.msk [vmem:[%s1442_s25 + $0xc0] sm:$0xff] %vm953_vm1, %v849_v38  ;;  %731 = vadd.xlane.f32.xlu1 %v730_v32  ;;  %728 = vadd.xlane.f32.xlu0 %v727_v33  ;;  %v421_v32 = vmul.f32 %v1629_v1, %v286_v26  ;;  %v420_v33 = vmul.f32 %v1629_v1, %v285_v27  ;;  %v288_v37 = vld [vmem:[%s1211_s21 + $0x388] sm:$0xff]  ;;  %v287_v38 = vld [vmem:[%s1211_s21 + $0x380] sm:$0xff] }
  0xd6   : > { %v522_v41 = vpop.xlane.xlu1 %521  ;;  %v519_v42 = vpop.xlane.xlu0 %518 }
  0xd7   : > { %v852_v47 = vadd.f32 %v1435_v34, %v522_v41  ;;  %v851_v48 = vadd.f32 %v1435_v34, %v519_v42  ;;  %v772_v41 = vsel %vm438_vm0, %v421_v32, 0.0  ;;  %v769_v42 = vsel %vm438_vm0, %v420_v33, 0.0 }
  0xd9   : > { %981 = vst.msk [vmem:[%s1442_s25 + $0xd8] sm:$0xff] %vm953_vm1, %v852_v47  ;;  %980 = vst.msk [vmem:[%s1442_s25 + $0xd0] sm:$0xff] %vm953_vm1, %v851_v48  ;;  %737 = vadd.xlane.f32.xlu1 %v736_v43  ;;  %734 = vadd.xlane.f32.xlu0 %v733_v44  ;;  %v423_v43 = vmul.f32 %v1629_v1, %v288_v37  ;;  %v422_v44 = vmul.f32 %v1629_v1, %v287_v38  ;;  %v290_v47 = vld [vmem:[%s1211_s21 + $0x398] sm:$0xff]  ;;  %v289_v48 = vld [vmem:[%s1211_s21 + $0x390] sm:$0xff] }
  0xda   : > { %v528_v51 = vpop.xlane.xlu1 %527  ;;  %v525_v52 = vpop.xlane.xlu0 %524 }
  0xdb   : > { %v854_v57 = vadd.f32 %v1435_v34, %v528_v51  ;;  %v853_v58 = vadd.f32 %v1435_v34, %v525_v52  ;;  %v778_v51 = vsel %vm438_vm0, %v423_v43, 0.0  ;;  %v775_v52 = vsel %vm438_vm0, %v422_v44, 0.0 }
  0xdd   : > { %983 = vst.msk [vmem:[%s1442_s25 + $0xe8] sm:$0xff] %vm953_vm1, %v854_v57  ;;  %982 = vst.msk [vmem:[%s1442_s25 + $0xe0] sm:$0xff] %vm953_vm1, %v853_v58  ;;  %743 = vadd.xlane.f32.xlu1 %v742_v53  ;;  %740 = vadd.xlane.f32.xlu0 %v739_v54  ;;  %v425_v53 = vmul.f32 %v1629_v1, %v290_v47  ;;  %v424_v54 = vmul.f32 %v1629_v1, %v289_v48  ;;  %v292_v57 = vld [vmem:[%s1211_s21 + $0x3a8] sm:$0xff]  ;;  %v291_v58 = vld [vmem:[%s1211_s21 + $0x3a0] sm:$0xff] }
  0xde   : > { %v534_v61 = vpop.xlane.xlu1 %533  ;;  %v531_v62 = vpop.xlane.xlu0 %530 }
  0xdf   : > { %v856_v4 = vadd.f32 %v1435_v34, %v534_v61  ;;  %v855_v5 = vadd.f32 %v1435_v34, %v531_v62  ;;  %v784_v61 = vsel %vm438_vm0, %v425_v53, 0.0  ;;  %v781_v62 = vsel %vm438_vm0, %v424_v54, 0.0 }
  0xe1   : > { %985 = vst.msk [vmem:[%s1442_s25 + $0xf8] sm:$0xff] %vm953_vm1, %v856_v4  ;;  %984 = vst.msk [vmem:[%s1442_s25 + $0xf0] sm:$0xff] %vm953_vm1, %v855_v5  ;;  %749 = vadd.xlane.f32.xlu1 %v748_v0  ;;  %746 = vadd.xlane.f32.xlu0 %v745_v63  ;;  %v427_v0 = vmul.f32 %v1629_v1, %v292_v57  ;;  %v426_v63 = vmul.f32 %v1629_v1, %v291_v58  ;;  %v294_v4 = vld [vmem:[%s1211_s21 + $0x3b8] sm:$0xff]  ;;  %v293_v5 = vld [vmem:[%s1211_s21 + $0x3b0] sm:$0xff] }
  0xe2   : > { %v540_v8 = vpop.xlane.xlu1 %539  ;;  %v537_v9 = vpop.xlane.xlu0 %536 }
  0xe3   : > { %v858_v14 = vadd.f32 %v1435_v34, %v540_v8  ;;  %v857_v15 = vadd.f32 %v1435_v34, %v537_v9  ;;  %v790_v8 = vsel %vm438_vm0, %v427_v0, 0.0  ;;  %v787_v9 = vsel %vm438_vm0, %v426_v63, 0.0 }
  0xe5   : > { %987 = vst.msk [vmem:[%s1442_s25 + $0x108] sm:$0xff] %vm953_vm1, %v858_v14  ;;  %986 = vst.msk [vmem:[%s1442_s25 + $0x100] sm:$0xff] %vm953_vm1, %v857_v15  ;;  %755 = vadd.xlane.f32.xlu1 %v754_v10  ;;  %752 = vadd.xlane.f32.xlu0 %v751_v11  ;;  %v429_v10 = vmul.f32 %v1629_v1, %v294_v4  ;;  %v428_v11 = vmul.f32 %v1629_v1, %v293_v5  ;;  %v296_v14 = vld [vmem:[%s1211_s21 + $0x3c8] sm:$0xff]  ;;  %v295_v15 = vld [vmem:[%s1211_s21 + $0x3c0] sm:$0xff] }
  0xe6   : > { %v546_v18 = vpop.xlane.xlu1 %545  ;;  %v543_v19 = vpop.xlane.xlu0 %542 }
  0xe7   : > { %v860_v24 = vadd.f32 %v1435_v34, %v546_v18  ;;  %v859_v25 = vadd.f32 %v1435_v34, %v543_v19  ;;  %v796_v18 = vsel %vm438_vm0, %v429_v10, 0.0  ;;  %v793_v19 = vsel %vm438_vm0, %v428_v11, 0.0 }
  0xe9   : > { %989 = vst.msk [vmem:[%s1442_s25 + $0x118] sm:$0xff] %vm953_vm1, %v860_v24  ;;  %988 = vst.msk [vmem:[%s1442_s25 + $0x110] sm:$0xff] %vm953_vm1, %v859_v25  ;;  %761 = vadd.xlane.f32.xlu1 %v760_v20  ;;  %758 = vadd.xlane.f32.xlu0 %v757_v21  ;;  %v431_v20 = vmul.f32 %v1629_v1, %v296_v14  ;;  %v430_v21 = vmul.f32 %v1629_v1, %v295_v15  ;;  %v298_v24 = vld [vmem:[%s1211_s21 + $0x3d8] sm:$0xff]  ;;  %v297_v25 = vld [vmem:[%s1211_s21 + $0x3d0] sm:$0xff] }
  0xea   : > { %v552_v28 = vpop.xlane.xlu1 %551  ;;  %v549_v29 = vpop.xlane.xlu0 %548 }
  0xeb   : > { %v862_v35 = vadd.f32 %v1435_v34, %v552_v28  ;;  %v861_v36 = vadd.f32 %v1435_v34, %v549_v29  ;;  %v802_v28 = vsel %vm438_vm0, %v431_v20, 0.0  ;;  %v799_v29 = vsel %vm438_vm0, %v430_v21, 0.0 }
  0xed   : > { %991 = vst.msk [vmem:[%s1442_s25 + $0x128] sm:$0xff] %vm953_vm1, %v862_v35  ;;  %990 = vst.msk [vmem:[%s1442_s25 + $0x120] sm:$0xff] %vm953_vm1, %v861_v36  ;;  %767 = vadd.xlane.f32.xlu1 %v766_v30  ;;  %764 = vadd.xlane.f32.xlu0 %v763_v31  ;;  %v433_v30 = vmul.f32 %v1629_v1, %v298_v24  ;;  %v432_v31 = vmul.f32 %v1629_v1, %v297_v25  ;;  %v300_v35 = vld [vmem:[%s1211_s21 + $0x3e8] sm:$0xff]  ;;  %v299_v36 = vld [vmem:[%s1211_s21 + $0x3e0] sm:$0xff] }
  0xee   : > { %v558_v39 = vpop.xlane.xlu1 %557  ;;  %v555_v40 = vpop.xlane.xlu0 %554 }
  0xef   : > { %v864_v45 = vadd.f32 %v1435_v34, %v558_v39  ;;  %v863_v46 = vadd.f32 %v1435_v34, %v555_v40  ;;  %v808_v39 = vsel %vm438_vm0, %v433_v30, 0.0  ;;  %v805_v40 = vsel %vm438_vm0, %v432_v31, 0.0 }
  0xf1   : > { %993 = vst.msk [vmem:[%s1442_s25 + $0x138] sm:$0xff] %vm953_vm1, %v864_v45  ;;  %992 = vst.msk [vmem:[%s1442_s25 + $0x130] sm:$0xff] %vm953_vm1, %v863_v46  ;;  %773 = vadd.xlane.f32.xlu1 %v772_v41  ;;  %770 = vadd.xlane.f32.xlu0 %v769_v42  ;;  %v435_v41 = vmul.f32 %v1629_v1, %v300_v35  ;;  %v434_v42 = vmul.f32 %v1629_v1, %v299_v36  ;;  %v302_v45 = vld [vmem:[%s1211_s21 + $0x3f8] sm:$0xff]  ;;  %v301_v46 = vld [vmem:[%s1211_s21 + $0x3f0] sm:$0xff] }
  0xf2   : > { %v564_v49 = vpop.xlane.xlu1 %563  ;;  %v561_v50 = vpop.xlane.xlu0 %560 }
  0xf3   : > { %v866_v55 = vadd.f32 %v1435_v34, %v564_v49  ;;  %v865_v56 = vadd.f32 %v1435_v34, %v561_v50  ;;  %v814_v49 = vsel %vm438_vm0, %v435_v41, 0.0  ;;  %v811_v50 = vsel %vm438_vm0, %v434_v42, 0.0 }
  0xf5   : > { %995 = vst.msk [vmem:[%s1442_s25 + $0x148] sm:$0xff] %vm953_vm1, %v866_v55  ;;  %994 = vst.msk [vmem:[%s1442_s25 + $0x140] sm:$0xff] %vm953_vm1, %v865_v56  ;;  %779 = vadd.xlane.f32.xlu1 %v778_v51  ;;  %776 = vadd.xlane.f32.xlu0 %v775_v52  ;;  %v437_v51 = vmul.f32 %v1629_v1, %v302_v45  ;;  %v436_v52 = vmul.f32 %v1629_v1, %v301_v46 }
  0xf6   : > { %v570_v59 = vpop.xlane.xlu1 %569  ;;  %v567_v60 = vpop.xlane.xlu0 %566 }
  0xf7   : > { %v868_v2 = vadd.f32 %v1435_v34, %v570_v59  ;;  %v867_v3 = vadd.f32 %v1435_v34, %v567_v60  ;;  %v820_v57 = vsel %vm438_vm0, %v437_v51, 0.0  ;;  %v817_v58 = vsel %vm438_vm0, %v436_v52, 0.0 }
  0xf9   : > { %997 = vst.msk [vmem:[%s1442_s25 + $0x158] sm:$0xff] %vm953_vm1, %v868_v2  ;;  %996 = vst.msk [vmem:[%s1442_s25 + $0x150] sm:$0xff] %vm953_vm1, %v867_v3  ;;  %785 = vadd.xlane.f32.xlu1 %v784_v61  ;;  %782 = vadd.xlane.f32.xlu0 %v781_v62 }
  0xfa   : > { %v576_v6 = vpop.xlane.xlu1 %575  ;;  %v573_v7 = vpop.xlane.xlu0 %572 }
  0xfb   : > { %v870_v12 = vadd.f32 %v1435_v34, %v576_v6  ;;  %v869_v13 = vadd.f32 %v1435_v34, %v573_v7 }
  0xfd   : > { %999 = vst.msk [vmem:[%s1442_s25 + $0x168] sm:$0xff] %vm953_vm1, %v870_v12  ;;  %998 = vst.msk [vmem:[%s1442_s25 + $0x160] sm:$0xff] %vm953_vm1, %v869_v13  ;;  %791 = vadd.xlane.f32.xlu1 %v790_v8  ;;  %788 = vadd.xlane.f32.xlu0 %v787_v9 }
  0xfe   : > { %v582_v16 = vpop.xlane.xlu1 %581  ;;  %v579_v17 = vpop.xlane.xlu0 %578 }
  0xff   : > { %v872_v22 = vadd.f32 %v1435_v34, %v582_v16  ;;  %v871_v23 = vadd.f32 %v1435_v34, %v579_v17 }
 0x101   : > { %1001 = vst.msk [vmem:[%s1442_s25 + $0x178] sm:$0xff] %vm953_vm1, %v872_v22  ;;  %1000 = vst.msk [vmem:[%s1442_s25 + $0x170] sm:$0xff] %vm953_vm1, %v871_v23  ;;  %797 = vadd.xlane.f32.xlu1 %v796_v18  ;;  %794 = vadd.xlane.f32.xlu0 %v793_v19 }
 0x102   : > { %v588_v26 = vpop.xlane.xlu1 %587  ;;  %v585_v27 = vpop.xlane.xlu0 %584 }
 0x103   : > { %v874_v32 = vadd.f32 %v1435_v34, %v588_v26  ;;  %v873_v33 = vadd.f32 %v1435_v34, %v585_v27 }
 0x105   : > { %1003 = vst.msk [vmem:[%s1442_s25 + $0x188] sm:$0xff] %vm953_vm1, %v874_v32  ;;  %1002 = vst.msk [vmem:[%s1442_s25 + $0x180] sm:$0xff] %vm953_vm1, %v873_v33  ;;  %803 = vadd.xlane.f32.xlu1 %v802_v28  ;;  %800 = vadd.xlane.f32.xlu0 %v799_v29 }
 0x106   : > { %v594_v37 = vpop.xlane.xlu1 %593  ;;  %v591_v38 = vpop.xlane.xlu0 %590 }
 0x107   : > { %v876_v43 = vadd.f32 %v1435_v34, %v594_v37  ;;  %v875_v44 = vadd.f32 %v1435_v34, %v591_v38 }
 0x109   : > { %1005 = vst.msk [vmem:[%s1442_s25 + $0x198] sm:$0xff] %vm953_vm1, %v876_v43  ;;  %1004 = vst.msk [vmem:[%s1442_s25 + $0x190] sm:$0xff] %vm953_vm1, %v875_v44  ;;  %809 = vadd.xlane.f32.xlu1 %v808_v39  ;;  %806 = vadd.xlane.f32.xlu0 %v805_v40 }
 0x10a   : > { %v600_v47 = vpop.xlane.xlu1 %599  ;;  %v597_v48 = vpop.xlane.xlu0 %596 }
 0x10b   : > { %v878_v53 = vadd.f32 %v1435_v34, %v600_v47  ;;  %v877_v54 = vadd.f32 %v1435_v34, %v597_v48 }
 0x10d   : > { %1007 = vst.msk [vmem:[%s1442_s25 + $0x1a8] sm:$0xff] %vm953_vm1, %v878_v53  ;;  %1006 = vst.msk [vmem:[%s1442_s25 + $0x1a0] sm:$0xff] %vm953_vm1, %v877_v54  ;;  %815 = vadd.xlane.f32.xlu1 %v814_v49  ;;  %812 = vadd.xlane.f32.xlu0 %v811_v50 }
 0x10e   : > { %v606_v55 = vpop.xlane.xlu1 %605  ;;  %v603_v56 = vpop.xlane.xlu0 %602 }
 0x10f   : > { %v880_v1 = vadd.f32 %v1435_v34, %v606_v55  ;;  %v879_v59 = vadd.f32 %v1435_v34, %v603_v56 }
 0x111   : > { %1009 = vst.msk [vmem:[%s1442_s25 + $0x1b8] sm:$0xff] %vm953_vm1, %v880_v1  ;;  %1008 = vst.msk [vmem:[%s1442_s25 + $0x1b0] sm:$0xff] %vm953_vm1, %v879_v59  ;;  %821 = vadd.xlane.f32.xlu1 %v820_v57  ;;  %818 = vadd.xlane.f32.xlu0 %v817_v58 }
 0x112   : > { %v612_v60 = vpop.xlane.xlu1 %611  ;;  %v609_v61 = vpop.xlane.xlu0 %608 }
 0x113   : > { %v882_v62 = vadd.f32 %v1435_v34, %v612_v60  ;;  %v881_v0 = vadd.f32 %v1435_v34, %v609_v61 }
 0x115   : > { %1011 = vst.msk [vmem:[%s1442_s25 + $0x1c8] sm:$0xff] %vm953_vm1, %v882_v62  ;;  %1010 = vst.msk [vmem:[%s1442_s25 + $0x1c0] sm:$0xff] %vm953_vm1, %v881_v0 }
 0x116   : > { %v618_v63 = vpop.xlane.xlu1 %617  ;;  %v615_v2 = vpop.xlane.xlu0 %614 }
 0x117   : > { %v884_v3 = vadd.f32 %v1435_v34, %v618_v63  ;;  %v883_v4 = vadd.f32 %v1435_v34, %v615_v2 }
 0x119   : > { %1013 = vst.msk [vmem:[%s1442_s25 + $0x1d8] sm:$0xff] %vm953_vm1, %v884_v3  ;;  %1012 = vst.msk [vmem:[%s1442_s25 + $0x1d0] sm:$0xff] %vm953_vm1, %v883_v4 }
 0x11a   : > { %v624_v5 = vpop.xlane.xlu1 %623  ;;  %v621_v6 = vpop.xlane.xlu0 %620 }
 0x11b   : > { %v886_v7 = vadd.f32 %v1435_v34, %v624_v5  ;;  %v885_v8 = vadd.f32 %v1435_v34, %v621_v6 }
 0x11d   : > { %1015 = vst.msk [vmem:[%s1442_s25 + $0x1e8] sm:$0xff] %vm953_vm1, %v886_v7  ;;  %1014 = vst.msk [vmem:[%s1442_s25 + $0x1e0] sm:$0xff] %vm953_vm1, %v885_v8 }
 0x11e   : > { %v630_v9 = vpop.xlane.xlu1 %629  ;;  %v627_v10 = vpop.xlane.xlu0 %626 }
 0x11f   : > { %v888_v11 = vadd.f32 %v1435_v34, %v630_v9  ;;  %v887_v12 = vadd.f32 %v1435_v34, %v627_v10 }
 0x121   : > { %1017 = vst.msk [vmem:[%s1442_s25 + $0x1f8] sm:$0xff] %vm953_vm1, %v888_v11  ;;  %1016 = vst.msk [vmem:[%s1442_s25 + $0x1f0] sm:$0xff] %vm953_vm1, %v887_v12 }
 0x122   : > { %v636_v13 = vpop.xlane.xlu1 %635  ;;  %v633_v14 = vpop.xlane.xlu0 %632 }
 0x123   : > { %v890_v15 = vadd.f32 %v1435_v34, %v636_v13  ;;  %v889_v16 = vadd.f32 %v1435_v34, %v633_v14 }
 0x125   : > { %1019 = vst.msk [vmem:[%s1442_s25 + $0x208] sm:$0xff] %vm953_vm1, %v890_v15  ;;  %1018 = vst.msk [vmem:[%s1442_s25 + $0x200] sm:$0xff] %vm953_vm1, %v889_v16 }
 0x126   : > { %v642_v17 = vpop.xlane.xlu1 %641  ;;  %v639_v18 = vpop.xlane.xlu0 %638 }
 0x127   : > { %v892_v19 = vadd.f32 %v1435_v34, %v642_v17  ;;  %v891_v20 = vadd.f32 %v1435_v34, %v639_v18 }
 0x129   : > { %1021 = vst.msk [vmem:[%s1442_s25 + $0x218] sm:$0xff] %vm953_vm1, %v892_v19  ;;  %1020 = vst.msk [vmem:[%s1442_s25 + $0x210] sm:$0xff] %vm953_vm1, %v891_v20 }
 0x12a   : > { %v648_v21 = vpop.xlane.xlu1 %647  ;;  %v645_v22 = vpop.xlane.xlu0 %644 }
 0x12b   : > { %v894_v23 = vadd.f32 %v1435_v34, %v648_v21  ;;  %v893_v24 = vadd.f32 %v1435_v34, %v645_v22 }
 0x12d   : > { %1023 = vst.msk [vmem:[%s1442_s25 + $0x228] sm:$0xff] %vm953_vm1, %v894_v23  ;;  %1022 = vst.msk [vmem:[%s1442_s25 + $0x220] sm:$0xff] %vm953_vm1, %v893_v24 }
 0x12e   : > { %v654_v25 = vpop.xlane.xlu1 %653  ;;  %v651_v26 = vpop.xlane.xlu0 %650 }
 0x12f   : > { %v896_v27 = vadd.f32 %v1435_v34, %v654_v25  ;;  %v895_v28 = vadd.f32 %v1435_v34, %v651_v26 }
 0x131   : > { %1025 = vst.msk [vmem:[%s1442_s25 + $0x238] sm:$0xff] %vm953_vm1, %v896_v27  ;;  %1024 = vst.msk [vmem:[%s1442_s25 + $0x230] sm:$0xff] %vm953_vm1, %v895_v28 }
 0x132   : > { %v660_v29 = vpop.xlane.xlu1 %659  ;;  %v657_v30 = vpop.xlane.xlu0 %656 }
 0x133   : > { %v898_v31 = vadd.f32 %v1435_v34, %v660_v29  ;;  %v897_v32 = vadd.f32 %v1435_v34, %v657_v30 }
 0x135   : > { %1027 = vst.msk [vmem:[%s1442_s25 + $0x248] sm:$0xff] %vm953_vm1, %v898_v31  ;;  %1026 = vst.msk [vmem:[%s1442_s25 + $0x240] sm:$0xff] %vm953_vm1, %v897_v32 }
 0x136   : > { %v666_v33 = vpop.xlane.xlu1 %665  ;;  %v663_v35 = vpop.xlane.xlu0 %662 }
 0x137   : > { %v900_v36 = vadd.f32 %v1435_v34, %v666_v33  ;;  %v899_v37 = vadd.f32 %v1435_v34, %v663_v35 }
 0x139   : > { %1029 = vst.msk [vmem:[%s1442_s25 + $0x258] sm:$0xff] %vm953_vm1, %v900_v36  ;;  %1028 = vst.msk [vmem:[%s1442_s25 + $0x250] sm:$0xff] %vm953_vm1, %v899_v37 }
 0x13a   : > { %v672_v38 = vpop.xlane.xlu1 %671  ;;  %v669_v39 = vpop.xlane.xlu0 %668 }
 0x13b   : > { %v902_v40 = vadd.f32 %v1435_v34, %v672_v38  ;;  %v901_v41 = vadd.f32 %v1435_v34, %v669_v39 }
 0x13d   : > { %1031 = vst.msk [vmem:[%s1442_s25 + $0x268] sm:$0xff] %vm953_vm1, %v902_v40  ;;  %1030 = vst.msk [vmem:[%s1442_s25 + $0x260] sm:$0xff] %vm953_vm1, %v901_v41 }
 0x13e   : > { %v678_v42 = vpop.xlane.xlu1 %677  ;;  %v675_v43 = vpop.xlane.xlu0 %674 }
 0x13f   : > { %v904_v44 = vadd.f32 %v1435_v34, %v678_v42  ;;  %v903_v45 = vadd.f32 %v1435_v34, %v675_v43 }
 0x141   : > { %1033 = vst.msk [vmem:[%s1442_s25 + $0x278] sm:$0xff] %vm953_vm1, %v904_v44  ;;  %1032 = vst.msk [vmem:[%s1442_s25 + $0x270] sm:$0xff] %vm953_vm1, %v903_v45 }
 0x142   : > { %v684_v46 = vpop.xlane.xlu1 %683  ;;  %v681_v47 = vpop.xlane.xlu0 %680 }
 0x143   : > { %v906_v48 = vadd.f32 %v1435_v34, %v684_v46  ;;  %v905_v49 = vadd.f32 %v1435_v34, %v681_v47 }
 0x145   : > { %1035 = vst.msk [vmem:[%s1442_s25 + $0x288] sm:$0xff] %vm953_vm1, %v906_v48  ;;  %1034 = vst.msk [vmem:[%s1442_s25 + $0x280] sm:$0xff] %vm953_vm1, %v905_v49 }
 0x146   : > { %v690_v50 = vpop.xlane.xlu1 %689  ;;  %v687_v51 = vpop.xlane.xlu0 %686 }
 0x147   : > { %v908_v52 = vadd.f32 %v1435_v34, %v690_v50  ;;  %v907_v53 = vadd.f32 %v1435_v34, %v687_v51 }
 0x149   : > { %1037 = vst.msk [vmem:[%s1442_s25 + $0x298] sm:$0xff] %vm953_vm1, %v908_v52  ;;  %1036 = vst.msk [vmem:[%s1442_s25 + $0x290] sm:$0xff] %vm953_vm1, %v907_v53 }
 0x14a   : > { %v696_v54 = vpop.xlane.xlu1 %695  ;;  %v693_v55 = vpop.xlane.xlu0 %692 }
 0x14b   : > { %v910_v56 = vadd.f32 %v1435_v34, %v696_v54  ;;  %v909_v57 = vadd.f32 %v1435_v34, %v693_v55 }
 0x14d   : > { %1039 = vst.msk [vmem:[%s1442_s25 + $0x2a8] sm:$0xff] %vm953_vm1, %v910_v56  ;;  %1038 = vst.msk [vmem:[%s1442_s25 + $0x2a0] sm:$0xff] %vm953_vm1, %v909_v57 }
 0x14e   : > { %v702_v58 = vpop.xlane.xlu1 %701  ;;  %v699_v1 = vpop.xlane.xlu0 %698 }
 0x14f   : > { %v912_v59 = vadd.f32 %v1435_v34, %v702_v58  ;;  %v911_v60 = vadd.f32 %v1435_v34, %v699_v1 }
 0x151   : > { %1041 = vst.msk [vmem:[%s1442_s25 + $0x2b8] sm:$0xff] %vm953_vm1, %v912_v59  ;;  %1040 = vst.msk [vmem:[%s1442_s25 + $0x2b0] sm:$0xff] %vm953_vm1, %v911_v60 }
 0x152   : > { %v708_v61 = vpop.xlane.xlu1 %707  ;;  %v705_v62 = vpop.xlane.xlu0 %704 }
 0x153   : > { %v914_v0 = vadd.f32 %v1435_v34, %v708_v61  ;;  %v913_v63 = vadd.f32 %v1435_v34, %v705_v62 }
 0x155   : > { %1043 = vst.msk [vmem:[%s1442_s25 + $0x2c8] sm:$0xff] %vm953_vm1, %v914_v0  ;;  %1042 = vst.msk [vmem:[%s1442_s25 + $0x2c0] sm:$0xff] %vm953_vm1, %v913_v63 }
 0x156   : > { %v714_v2 = vpop.xlane.xlu1 %713  ;;  %v711_v3 = vpop.xlane.xlu0 %710 }
 0x157   : > { %v916_v4 = vadd.f32 %v1435_v34, %v714_v2  ;;  %v915_v5 = vadd.f32 %v1435_v34, %v711_v3 }
 0x159   : > { %1045 = vst.msk [vmem:[%s1442_s25 + $0x2d8] sm:$0xff] %vm953_vm1, %v916_v4  ;;  %1044 = vst.msk [vmem:[%s1442_s25 + $0x2d0] sm:$0xff] %vm953_vm1, %v915_v5 }
 0x15a   : > { %v720_v6 = vpop.xlane.xlu1 %719  ;;  %v717_v7 = vpop.xlane.xlu0 %716 }
 0x15b   : > { %v918_v8 = vadd.f32 %v1435_v34, %v720_v6  ;;  %v917_v9 = vadd.f32 %v1435_v34, %v717_v7 }
 0x15d   : > { %1047 = vst.msk [vmem:[%s1442_s25 + $0x2e8] sm:$0xff] %vm953_vm1, %v918_v8  ;;  %1046 = vst.msk [vmem:[%s1442_s25 + $0x2e0] sm:$0xff] %vm953_vm1, %v917_v9 }
 0x15e   : > { %v726_v10 = vpop.xlane.xlu1 %725  ;;  %v723_v11 = vpop.xlane.xlu0 %722 }
 0x15f   : > { %v920_v12 = vadd.f32 %v1435_v34, %v726_v10  ;;  %v919_v13 = vadd.f32 %v1435_v34, %v723_v11 }
 0x161   : > { %1049 = vst.msk [vmem:[%s1442_s25 + $0x2f8] sm:$0xff] %vm953_vm1, %v920_v12  ;;  %1048 = vst.msk [vmem:[%s1442_s25 + $0x2f0] sm:$0xff] %vm953_vm1, %v919_v13 }
 0x162   : > { %v732_v14 = vpop.xlane.xlu1 %731  ;;  %v729_v15 = vpop.xlane.xlu0 %728 }
 0x163   : > { %v922_v16 = vadd.f32 %v1435_v34, %v732_v14  ;;  %v921_v17 = vadd.f32 %v1435_v34, %v729_v15 }
 0x165   : > { %1051 = vst.msk [vmem:[%s1442_s25 + $0x308] sm:$0xff] %vm953_vm1, %v922_v16  ;;  %1050 = vst.msk [vmem:[%s1442_s25 + $0x300] sm:$0xff] %vm953_vm1, %v921_v17 }
 0x166   : > { %v738_v18 = vpop.xlane.xlu1 %737  ;;  %v735_v19 = vpop.xlane.xlu0 %734 }
 0x167   : > { %v924_v20 = vadd.f32 %v1435_v34, %v738_v18  ;;  %v923_v21 = vadd.f32 %v1435_v34, %v735_v19 }
 0x169   : > { %1053 = vst.msk [vmem:[%s1442_s25 + $0x318] sm:$0xff] %vm953_vm1, %v924_v20  ;;  %1052 = vst.msk [vmem:[%s1442_s25 + $0x310] sm:$0xff] %vm953_vm1, %v923_v21 }
 0x16a   : > { %v744_v22 = vpop.xlane.xlu1 %743  ;;  %v741_v23 = vpop.xlane.xlu0 %740 }
 0x16b   : > { %v926_v24 = vadd.f32 %v1435_v34, %v744_v22  ;;  %v925_v25 = vadd.f32 %v1435_v34, %v741_v23 }
 0x16d   : > { %1055 = vst.msk [vmem:[%s1442_s25 + $0x328] sm:$0xff] %vm953_vm1, %v926_v24  ;;  %1054 = vst.msk [vmem:[%s1442_s25 + $0x320] sm:$0xff] %vm953_vm1, %v925_v25 }
 0x16e   : > { %v750_v26 = vpop.xlane.xlu1 %749  ;;  %v747_v27 = vpop.xlane.xlu0 %746 }
 0x16f   : > { %v928_v28 = vadd.f32 %v1435_v34, %v750_v26  ;;  %v927_v29 = vadd.f32 %v1435_v34, %v747_v27 }
 0x171   : > { %1057 = vst.msk [vmem:[%s1442_s25 + $0x338] sm:$0xff] %vm953_vm1, %v928_v28  ;;  %1056 = vst.msk [vmem:[%s1442_s25 + $0x330] sm:$0xff] %vm953_vm1, %v927_v29 }
 0x172   : > { %v756_v30 = vpop.xlane.xlu1 %755  ;;  %v753_v31 = vpop.xlane.xlu0 %752 }
 0x173   : > { %v930_v32 = vadd.f32 %v1435_v34, %v756_v30  ;;  %v929_v33 = vadd.f32 %v1435_v34, %v753_v31 }
 0x175   : > { %1059 = vst.msk [vmem:[%s1442_s25 + $0x348] sm:$0xff] %vm953_vm1, %v930_v32  ;;  %1058 = vst.msk [vmem:[%s1442_s25 + $0x340] sm:$0xff] %vm953_vm1, %v929_v33 }
 0x176   : > { %v762_v35 = vpop.xlane.xlu1 %761  ;;  %v759_v36 = vpop.xlane.xlu0 %758 }
 0x177   : > { %v932_v37 = vadd.f32 %v1435_v34, %v762_v35  ;;  %v931_v38 = vadd.f32 %v1435_v34, %v759_v36 }
 0x179   : > { %1061 = vst.msk [vmem:[%s1442_s25 + $0x358] sm:$0xff] %vm953_vm1, %v932_v37  ;;  %1060 = vst.msk [vmem:[%s1442_s25 + $0x350] sm:$0xff] %vm953_vm1, %v931_v38 }
 0x17a   : > { %v768_v39 = vpop.xlane.xlu1 %767  ;;  %v765_v40 = vpop.xlane.xlu0 %764 }
 0x17b   : > { %v934_v41 = vadd.f32 %v1435_v34, %v768_v39  ;;  %v933_v42 = vadd.f32 %v1435_v34, %v765_v40 }
 0x17d   : > { %1063 = vst.msk [vmem:[%s1442_s25 + $0x368] sm:$0xff] %vm953_vm1, %v934_v41  ;;  %1062 = vst.msk [vmem:[%s1442_s25 + $0x360] sm:$0xff] %vm953_vm1, %v933_v42 }
 0x17e   : > { %v774_v43 = vpop.xlane.xlu1 %773  ;;  %v771_v44 = vpop.xlane.xlu0 %770 }
 0x17f   : > { %v936_v45 = vadd.f32 %v1435_v34, %v774_v43  ;;  %v935_v46 = vadd.f32 %v1435_v34, %v771_v44 }
 0x181   : > { %1065 = vst.msk [vmem:[%s1442_s25 + $0x378] sm:$0xff] %vm953_vm1, %v936_v45  ;;  %1064 = vst.msk [vmem:[%s1442_s25 + $0x370] sm:$0xff] %vm953_vm1, %v935_v46 }
 0x182   : > { %v780_v47 = vpop.xlane.xlu1 %779  ;;  %v777_v48 = vpop.xlane.xlu0 %776 }
 0x183   : > { %v938_v49 = vadd.f32 %v1435_v34, %v780_v47  ;;  %v937_v50 = vadd.f32 %v1435_v34, %v777_v48 }
 0x185   : > { %1067 = vst.msk [vmem:[%s1442_s25 + $0x388] sm:$0xff] %vm953_vm1, %v938_v49  ;;  %1066 = vst.msk [vmem:[%s1442_s25 + $0x380] sm:$0xff] %vm953_vm1, %v937_v50 }
 0x186   : > { %v786_v51 = vpop.xlane.xlu1 %785  ;;  %v783_v52 = vpop.xlane.xlu0 %782 }
 0x187   : > { %v940_v53 = vadd.f32 %v1435_v34, %v786_v51  ;;  %v939_v54 = vadd.f32 %v1435_v34, %v783_v52 }
 0x189   : > { %1069 = vst.msk [vmem:[%s1442_s25 + $0x398] sm:$0xff] %vm953_vm1, %v940_v53  ;;  %1068 = vst.msk [vmem:[%s1442_s25 + $0x390] sm:$0xff] %vm953_vm1, %v939_v54 }
 0x18a   : > { %v792_v55 = vpop.xlane.xlu1 %791  ;;  %v789_v56 = vpop.xlane.xlu0 %788 }
 0x18b   : > { %v942_v57 = vadd.f32 %v1435_v34, %v792_v55  ;;  %v941_v58 = vadd.f32 %v1435_v34, %v789_v56 }
 0x18d   : > { %1071 = vst.msk [vmem:[%s1442_s25 + $0x3a8] sm:$0xff] %vm953_vm1, %v942_v57  ;;  %1070 = vst.msk [vmem:[%s1442_s25 + $0x3a0] sm:$0xff] %vm953_vm1, %v941_v58 }
 0x18e   : > { %v798_v1 = vpop.xlane.xlu1 %797  ;;  %v795_v59 = vpop.xlane.xlu0 %794 }
 0x18f   : > { %v944_v60 = vadd.f32 %v1435_v34, %v798_v1  ;;  %v943_v61 = vadd.f32 %v1435_v34, %v795_v59 }
 0x191   : > { %1073 = vst.msk [vmem:[%s1442_s25 + $0x3b8] sm:$0xff] %vm953_vm1, %v944_v60  ;;  %1072 = vst.msk [vmem:[%s1442_s25 + $0x3b0] sm:$0xff] %vm953_vm1, %v943_v61 }
 0x192   : > { %v804_v62 = vpop.xlane.xlu1 %803  ;;  %v801_v0 = vpop.xlane.xlu0 %800 }
 0x193   : > { %v946_v63 = vadd.f32 %v1435_v34, %v804_v62  ;;  %v945_v2 = vadd.f32 %v1435_v34, %v801_v0 }
 0x195   : > { %1075 = vst.msk [vmem:[%s1442_s25 + $0x3c8] sm:$0xff] %vm953_vm1, %v946_v63  ;;  %1074 = vst.msk [vmem:[%s1442_s25 + $0x3c0] sm:$0xff] %vm953_vm1, %v945_v2 }
 0x196   : > { %v810_v3 = vpop.xlane.xlu1 %809  ;;  %v807_v4 = vpop.xlane.xlu0 %806 }
 0x197   : > { %v948_v5 = vadd.f32 %v1435_v34, %v810_v3  ;;  %v947_v6 = vadd.f32 %v1435_v34, %v807_v4 }
 0x199   : > { %1077 = vst.msk [vmem:[%s1442_s25 + $0x3d8] sm:$0xff] %vm953_vm1, %v948_v5  ;;  %1076 = vst.msk [vmem:[%s1442_s25 + $0x3d0] sm:$0xff] %vm953_vm1, %v947_v6 }
 0x19a   : > { %v816_v7 = vpop.xlane.xlu1 %815  ;;  %v813_v8 = vpop.xlane.xlu0 %812 }
 0x19b   : > { %v950_v9 = vadd.f32 %v1435_v34, %v816_v7  ;;  %v949_v10 = vadd.f32 %v1435_v34, %v813_v8 }
 0x19d   : > { %1079 = vst.msk [vmem:[%s1442_s25 + $0x3e8] sm:$0xff] %vm953_vm1, %v950_v9  ;;  %1078 = vst.msk [vmem:[%s1442_s25 + $0x3e0] sm:$0xff] %vm953_vm1, %v949_v10 }
 0x19e   : > { %v822_v11 = vpop.xlane.xlu1 %821  ;;  %v819_v12 = vpop.xlane.xlu0 %818 }
 0x19f   : > { %v952_v13 = vadd.f32 %v1435_v34, %v822_v11  ;;  %v951_v14 = vadd.f32 %v1435_v34, %v819_v12 }
 0x1a1   : > { %1081 = vst.msk [vmem:[%s1442_s25 + $0x3f8] sm:$0xff] %vm953_vm1, %v952_v13  ;;  %1080 = vst.msk [vmem:[%s1442_s25 + $0x3f0] sm:$0xff] %vm953_vm1, %v951_v14 }
 0x1a2 PF: > { %s14_s14 = sadd.s32 1, %s1165_s14  }
 0x1a3   : > { %p11_p4 = scmp.ge.s32.totalorder %s14_s14, 4  }
 0x1a5   :  { %13 = sbr.rel (!%p11_p4) target bundleno = 2 (0x2), region = 62 }

</bundles_post_ra>
